<compile_context>
chip_gen: v5e
topology: v5e:2x2
jax: 0.10.0
libtpu: 0.0.40
codegen_flags: <defaults>
</compile_context>

<pallas_src>
import jax
import jax.numpy as jnp
from jax.experimental import pallas as pl
from jax.experimental.pallas import tpu as pltpu

# Shapes implied by the data pipeline:
#   17 vertical slices * 10 radial patches * 3 normal components = 510 features
#   num_classes = len(set(label_mapper.values())) = 6
INPUT_DIM = 510
HIDDEN1 = 32
HIDDEN2 = 16
NUM_CLASSES = 6

K_PAD = 512           # 510 -> 4 * 128 lanes (dense, unmasked loads on layer 1)
OUT_PAD = 128         # lane-dense output tile (avoid vst.msk partial stores)
DEFAULT_TILE_B = 1024  # batch tile; ~1 MB/buffer in bf16, fits all chips' VMEM


def _round_up(x, m):
    return ((x + m - 1) // m) * m


def mlp_kernel(x_ref, w1_ref, b1_ref, w2_ref, b2_ref, w3_ref, b3_ref, o_ref):
    # x_ref: [TILE_B, 512] bf16, weights bf16, biases f32, o_ref: [TILE_B, 128] f32.
    # Layer 1 is ~97% of the FLOPs; layers 2/3 are tail work kept fused so
    # h1/h2 never leave VMEM.
    h1 = jnp.dot(x_ref[...], w1_ref[...], preferred_element_type=jnp.float32)
    h1 = jnp.maximum(h1 + b1_ref[...], 0.0)            # ReLU; Dropout = identity (eval)
    h2 = jnp.dot(h1.astype(jnp.bfloat16), w2_ref[...],
                 preferred_element_type=jnp.float32)
    h2 = jnp.maximum(h2 + b2_ref[...], 0.0)            # ReLU; Dropout = identity (eval)
    out = jnp.dot(h2.astype(jnp.bfloat16), w3_ref[...],
                  preferred_element_type=jnp.float32)
    o_ref[...] = (out + b3_ref[...]).astype(o_ref.dtype)


def simple_ann_forward(x, params, *, tile_b=DEFAULT_TILE_B):
    """x: [batch, 510] f32.  params: (w1,b1,w2,b2,w3,b3) with w stored [in, out]."""
    w1, b1, w2, b2, w3, b3 = params
    batch = x.shape[0]

    # Tiny batches: shrink the tile to a sublane-aligned minimum instead of a
    # full default tile (the kernel is launch/latency-bound there anyway).
    tile_b = min(tile_b, _round_up(max(batch, 1), 16))
    padded_batch = _round_up(batch, tile_b)
    grid = (padded_batch // tile_b,)

    # Wrapper-side layout prep (numerically exact: zero padding contributes 0):
    #   - pad K 510 -> 512, batch -> multiple of tile_b, out-features 6 -> 128
    #   - cast matmul operands to bf16 (f32 accumulation in-kernel)
    x_p = jnp.zeros((padded_batch, K_PAD), jnp.bfloat16)
    x_p = x_p.at[:batch, :INPUT_DIM].set(x.astype(jnp.bfloat16))
    w1_p = jnp.zeros((K_PAD, HIDDEN1), jnp.bfloat16)
    w1_p = w1_p.at[:INPUT_DIM, :].set(w1.astype(jnp.bfloat16))
    w2_p = w2.astype(jnp.bfloat16)
    w3_p = jnp.zeros((HIDDEN2, OUT_PAD), jnp.bfloat16)
    w3_p = w3_p.at[:, :NUM_CLASSES].set(w3.astype(jnp.bfloat16))
    b1_p = b1.astype(jnp.float32)
    b2_p = b2.astype(jnp.float32)
    b3_p = jnp.zeros((1, OUT_PAD), jnp.float32).at[:, :NUM_CLASSES].set(b3)

    # Weights/biases: constant index_map -> fetched once, resident across grid.
    def resident(shape):
        return pl.BlockSpec(shape, lambda i: (0, 0))

    out_padded = pl.pallas_call(
        mlp_kernel,
        out_shape=jax.ShapeDtypeStruct((padded_batch, OUT_PAD), jnp.float32),
        grid=grid,
        in_specs=[
            pl.BlockSpec((tile_b, K_PAD), lambda i: (i, 0)),  # x: streamed per batch tile
            resident((K_PAD, HIDDEN1)),
            resident((1, HIDDEN1)),
            resident((HIDDEN1, HIDDEN2)),
            resident((1, HIDDEN2)),
            resident((HIDDEN2, OUT_PAD)),
            resident((1, OUT_PAD)),
        ],
        out_specs=pl.BlockSpec((tile_b, OUT_PAD), lambda i: (i, 0)),
        compiler_params=pltpu.CompilerParams(
            dimension_semantics=("parallel",),  # megacore sharding on v7x
        ),
    )(x_p, w1_p, b1_p, w2_p, b2_p, w3_p, b3_p)

    # Strip batch padding and the lane padding of the logits.
    return out_padded[:batch, :NUM_CLASSES]


def init_params(key):
    """Deterministic init mirroring PyTorch nn.Linear default:
    U(-1/sqrt(fan_in), 1/sqrt(fan_in)) for both weight and bias."""
    def linear(k, fan_in, fan_out):
        kw, kb = jax.random.split(k)
        bound = 1.0 / jnp.sqrt(fan_in)
        # Stored as [in, out] (transposed vs. PyTorch's [out, in]).
        w = jax.random.uniform(kw, (fan_in, fan_out), jnp.float32, -bound, bound)
        b = jax.random.uniform(kb, (1, fan_out), jnp.float32, -bound, bound)
        return w, b

    k1, k2, k3 = jax.random.split(key, 3)
    w1, b1 = linear(k1, INPUT_DIM, HIDDEN1)
    w2, b2 = linear(k2, HIDDEN1, HIDDEN2)
    w3, b3 = linear(k3, HIDDEN2, NUM_CLASSES)
    return (w1, b1, w2, b2, w3, b3)


if __name__ == "__main__":
    key = jax.random.PRNGKey(0)
    k_params, k_x = jax.random.split(key)

    params = init_params(k_params)
    batch = 2
    x = jax.random.normal(k_x, (batch, INPUT_DIM), dtype=jnp.float32)

    out = simple_ann_forward(x, params)
    jax.block_until_ready(out)

    # Sanity check against plain-JAX f32 reference (bf16 matmul operands in the
    # kernel -> loosened tolerance; accumulation is f32 so error stays small).
    w1, b1, w2, b2, w3, b3 = params
    ref = jnp.maximum(x @ w1 + b1, 0.0)
    ref = jnp.maximum(ref @ w2 + b2, 0.0)
    ref = ref @ w3 + b3
    assert out.shape == (batch, NUM_CLASSES)
    assert jnp.allclose(out, ref, atol=2e-2, rtol=2e-2), float(jnp.max(jnp.abs(out - ref)))

    print("KERNEL_OK")
</pallas_src>

<mosaic_0001>
module attributes {stable_mosaic.version = 11 : i64} {
  func.func @mlp_kernel(%arg0: i32, %arg1: memref<16x512xbf16, #tpu.memory_space<vmem>>, %arg2: memref<512x32xbf16, #tpu.memory_space<vmem>>, %arg3: memref<1x32xf32, #tpu.memory_space<vmem>>, %arg4: memref<32x16xbf16, #tpu.memory_space<vmem>>, %arg5: memref<1x16xf32, #tpu.memory_space<vmem>>, %arg6: memref<16x128xbf16, #tpu.memory_space<vmem>>, %arg7: memref<1x128xf32, #tpu.memory_space<vmem>>, %arg8: memref<16x128xf32, #tpu.memory_space<vmem>>) attributes {dimension_semantics = [#tpu.dimension_semantics<parallel>], iteration_bounds = array<i64: 1>, scalar_prefetch = 0 : i64, scratch_operands = 0 : i64, tpu.core_type = #tpu.core_type<tc>, window_params = [{transform_indices = @transform_0, window_bounds = array<i64: 16, 512>}, {pipeline_mode = #tpu.pipeline_mode<synchronous>, transform_indices = @transform_1, window_bounds = array<i64: 512, 32>}, {pipeline_mode = #tpu.pipeline_mode<synchronous>, transform_indices = @transform_2, window_bounds = array<i64: 1, 32>}, {pipeline_mode = #tpu.pipeline_mode<synchronous>, transform_indices = @transform_3, window_bounds = array<i64: 32, 16>}, {pipeline_mode = #tpu.pipeline_mode<synchronous>, transform_indices = @transform_4, window_bounds = array<i64: 1, 16>}, {pipeline_mode = #tpu.pipeline_mode<synchronous>, transform_indices = @transform_5, window_bounds = array<i64: 16, 128>}, {pipeline_mode = #tpu.pipeline_mode<synchronous>, transform_indices = @transform_6, window_bounds = array<i64: 1, 128>}, {transform_indices = @transform_7, window_bounds = array<i64: 16, 128>}]} {
    %c0 = arith.constant 0 : index
    %c0_0 = arith.constant 0 : index
    %0 = vector.load %arg1[%c0, %c0_0] : memref<16x512xbf16, #tpu.memory_space<vmem>>, vector<16x512xbf16>
    %c0_1 = arith.constant 0 : index
    %c0_2 = arith.constant 0 : index
    %1 = vector.load %arg2[%c0_1, %c0_2] : memref<512x32xbf16, #tpu.memory_space<vmem>>, vector<512x32xbf16>
    %cst = arith.constant dense<0.000000e+00> : vector<16x32xf32>
    %2 = tpu.matmul %0, %1, %cst {dimension_numbers = #tpu.dot_dimension_numbers<[1], [0], [0], [1], [0, 0, 1, 1], [], []>} : vector<16x512xbf16>, vector<512x32xbf16>, vector<16x32xf32> -> vector<16x32xf32>
    %c0_3 = arith.constant 0 : index
    %c0_4 = arith.constant 0 : index
    %3 = vector.load %arg3[%c0_3, %c0_4] : memref<1x32xf32, #tpu.memory_space<vmem>>, vector<1x32xf32>
    %4 = vector.broadcast %3 : vector<1x32xf32> to vector<16x32xf32>
    %5 = arith.addf %2, %4 : vector<16x32xf32>
    %cst_5 = arith.constant 0.000000e+00 : f32
    %6 = vector.broadcast %cst_5 : f32 to vector<16x32xf32>
    %7 = arith.maximumf %5, %6 : vector<16x32xf32>
    %8 = arith.truncf %7 : vector<16x32xf32> to vector<16x32xbf16>
    %c0_6 = arith.constant 0 : index
    %c0_7 = arith.constant 0 : index
    %9 = vector.load %arg4[%c0_6, %c0_7] : memref<32x16xbf16, #tpu.memory_space<vmem>>, vector<32x16xbf16>
    %cst_8 = arith.constant dense<0.000000e+00> : vector<16x16xf32>
    %10 = tpu.matmul %8, %9, %cst_8 {dimension_numbers = #tpu.dot_dimension_numbers<[1], [0], [0], [1], [0, 0, 1, 1], [], []>} : vector<16x32xbf16>, vector<32x16xbf16>, vector<16x16xf32> -> vector<16x16xf32>
    %c0_9 = arith.constant 0 : index
    %c0_10 = arith.constant 0 : index
    %11 = vector.load %arg5[%c0_9, %c0_10] : memref<1x16xf32, #tpu.memory_space<vmem>>, vector<1x16xf32>
    %12 = vector.broadcast %11 : vector<1x16xf32> to vector<16x16xf32>
    %13 = arith.addf %10, %12 : vector<16x16xf32>
    %cst_11 = arith.constant 0.000000e+00 : f32
    %14 = vector.broadcast %cst_11 : f32 to vector<16x16xf32>
    %15 = arith.maximumf %13, %14 : vector<16x16xf32>
    %16 = arith.truncf %15 : vector<16x16xf32> to vector<16x16xbf16>
    %c0_12 = arith.constant 0 : index
    %c0_13 = arith.constant 0 : index
    %17 = vector.load %arg6[%c0_12, %c0_13] : memref<16x128xbf16, #tpu.memory_space<vmem>>, vector<16x128xbf16>
    %cst_14 = arith.constant dense<0.000000e+00> : vector<16x128xf32>
    %18 = tpu.matmul %16, %17, %cst_14 {dimension_numbers = #tpu.dot_dimension_numbers<[1], [0], [0], [1], [0, 0, 1, 1], [], []>} : vector<16x16xbf16>, vector<16x128xbf16>, vector<16x128xf32> -> vector<16x128xf32>
    %c0_15 = arith.constant 0 : index
    %c0_16 = arith.constant 0 : index
    %19 = vector.load %arg7[%c0_15, %c0_16] : memref<1x128xf32, #tpu.memory_space<vmem>>, vector<1x128xf32>
    %20 = vector.broadcast %19 : vector<1x128xf32> to vector<16x128xf32>
    %21 = arith.addf %18, %20 : vector<16x128xf32>
    %c0_17 = arith.constant 0 : index
    %c0_18 = arith.constant 0 : index
    %22 = vector.load %arg8[%c0_17, %c0_18] : memref<16x128xf32, #tpu.memory_space<vmem>>, vector<16x128xf32>
    tpu.vector_store %arg8[%c0_17, %c0_18], %21 {strides = array<i32>} : memref<16x128xf32, #tpu.memory_space<vmem>>, vector<16x128xf32>,
    return
  }
  func.func @transform_0(%arg0: i32) -> (i32, i32) {
    %c0_i32 = arith.constant 0 : i32
    %c0_i32_0 = arith.constant 0 : i32
    return %arg0, %c0_i32 : i32, i32
  }
  func.func @transform_1(%arg0: i32) -> (i32, i32) {
    %c0_i32 = arith.constant 0 : i32
    %c0_i32_0 = arith.constant 0 : i32
    %c0_i32_1 = arith.constant 0 : i32
    return %c0_i32, %c0_i32_0 : i32, i32
  }
  func.func @transform_2(%arg0: i32) -> (i32, i32) {
    %c0_i32 = arith.constant 0 : i32
    %c0_i32_0 = arith.constant 0 : i32
    %c0_i32_1 = arith.constant 0 : i32
    return %c0_i32, %c0_i32_0 : i32, i32
  }
  func.func @transform_3(%arg0: i32) -> (i32, i32) {
    %c0_i32 = arith.constant 0 : i32
    %c0_i32_0 = arith.constant 0 : i32
    %c0_i32_1 = arith.constant 0 : i32
    return %c0_i32, %c0_i32_0 : i32, i32
  }
  func.func @transform_4(%arg0: i32) -> (i32, i32) {
    %c0_i32 = arith.constant 0 : i32
    %c0_i32_0 = arith.constant 0 : i32
    %c0_i32_1 = arith.constant 0 : i32
    return %c0_i32, %c0_i32_0 : i32, i32
  }
  func.func @transform_5(%arg0: i32) -> (i32, i32) {
    %c0_i32 = arith.constant 0 : i32
    %c0_i32_0 = arith.constant 0 : i32
    %c0_i32_1 = arith.constant 0 : i32
    return %c0_i32, %c0_i32_0 : i32, i32
  }
  func.func @transform_6(%arg0: i32) -> (i32, i32) {
    %c0_i32 = arith.constant 0 : i32
    %c0_i32_0 = arith.constant 0 : i32
    %c0_i32_1 = arith.constant 0 : i32
    return %c0_i32, %c0_i32_0 : i32, i32
  }
  func.func @transform_7(%arg0: i32) -> (i32, i32) {
    %c0_i32 = arith.constant 0 : i32
    %c0_i32_0 = arith.constant 0 : i32
    return %arg0, %c0_i32 : i32, i32
  }
}

</mosaic_0001>

<bundles_post_ra>
// kernel: tpu_custom_call.1
= control target key start
LH: loop header
LB: loop body
LE: loop exit
PB: predicated region body
PF: predicated region fallthrough
CT: control target
= control target key end

     0   :  { %s875_s0 = inlined_call_operand.vmem [shape: bf16[16,512], index: 0, kind: input, shape index: {}]   ;;  %s876_s1 = inlined_call_operand.vmem [shape: bf16[512,32], index: 1, kind: input, shape index: {}]   ;;  %s877_s2 = inlined_call_operand.vmem [shape: f32[1,32], index: 2, kind: input, shape index: {}]   ;;  %s878_s3 = inlined_call_operand.vmem [shape: bf16[32,16], index: 3, kind: input, shape index: {}]   ;;  %s879_s4 = inlined_call_operand.vmem [shape: f32[1,16], index: 4, kind: input, shape index: {}]   ;;  %s880_s5 = inlined_call_operand.vmem [shape: bf16[16,128], index: 5, kind: input, shape index: {}]   ;;  %s881_s6 = inlined_call_operand.vmem [shape: f32[1,128], index: 6, kind: input, shape index: {}]   ;;  %s882_s7 = inlined_call_operand.hbm [shape: f32[16,128], index: 7, kind: output, shape index: {}]  }
   0x1   :  { %v631_v0 = vld [vmem:[%s876_s1 + $0x38] sm:$0xff]  ;;  %v630_v4 = vld [vmem:[%s876_s1 + $0x30] sm:$0xff]  ;;  %v629_v8 = vld [vmem:[%s876_s1 + $0x28] sm:$0xff] }
   0x2   :  { %v639_v1 = vld [vmem:[%s876_s1 + $0x78] sm:$0xff]  ;;  %312 = vmatpush.bf16.msra.mxu0 %v631_v0  ;;  %v638_v5 = vld [vmem:[%s876_s1 + $0x70] sm:$0xff]  ;;  %v637_v9 = vld [vmem:[%s876_s1 + $0x68] sm:$0xff] }
   0x3   :  { %v647_v2 = vld [vmem:[%s876_s1 + $0xb8] sm:$0xff]  ;;  %326 = vmatpush.bf16.msra.mxu1 %v639_v1  ;;  %v646_v6 = vld [vmem:[%s876_s1 + $0xb0] sm:$0xff]  ;;  %v645_v10 = vld [vmem:[%s876_s1 + $0xa8] sm:$0xff] }
   0x4   :  { %v655_v3 = vld [vmem:[%s876_s1 + $0xf8] sm:$0xff]  ;;  %340 = vmatpush.bf16.msra.mxu2 %v647_v2  ;;  %v654_v7 = vld [vmem:[%s876_s1 + $0xf0] sm:$0xff]  ;;  %v653_v11 = vld [vmem:[%s876_s1 + $0xe8] sm:$0xff] }
   0x5   :  { %354 = vmatpush.bf16.msra.mxu3 %v655_v3  ;;  %v628_v12 = vld [vmem:[%s876_s1 + $0x20] sm:$0xff]  ;;  %v627_v16 = vld [vmem:[%s876_s1 + $0x18] sm:$0xff] }
   0x6   :  { %313 = vmatpush.bf16.msra.mxu0 %v630_v4  ;;  %v636_v13 = vld [vmem:[%s876_s1 + $0x60] sm:$0xff]  ;;  %v635_v17 = vld [vmem:[%s876_s1 + $0x58] sm:$0xff] }
   0x7   :  { %327 = vmatpush.bf16.msra.mxu1 %v638_v5  ;;  %v644_v14 = vld [vmem:[%s876_s1 + $0xa0] sm:$0xff] }
   0x8   :  { %341 = vmatpush.bf16.msra.mxu2 %v646_v6  ;;  %v652_v15 = vld [vmem:[%s876_s1 + $0xe0] sm:$0xff] }
   0x9   :  { %355 = vmatpush.bf16.msra.mxu3 %v654_v7 }
   0xa   :  { %314 = vmatpush.bf16.msra.mxu0 %v629_v8 }
   0xb   :  { %328 = vmatpush.bf16.msra.mxu1 %v637_v9 }
   0xc   :  { %342 = vmatpush.bf16.msra.mxu2 %v645_v10 }
   0xd   :  { %356 = vmatpush.bf16.msra.mxu3 %v653_v11 }
   0xe   :  { %315 = vmatpush.bf16.msra.mxu0 %v628_v12 }
   0xf   :  { %329 = vmatpush.bf16.msra.mxu1 %v636_v13 }
  0x10   :  { %12 = vsyncpa [#allocation3], 0  ;;  %343 = vmatpush.bf16.msra.mxu2 %v644_v14  ;;  %v643_v18 = vld [vmem:[%s876_s1 + $0x98] sm:$0xff]  ;;  %v626_v20 = vld [vmem:[%s876_s1 + $0x10] sm:$0xff]  ;;  %vm391_vm0 = vcmask 261120   ;;  %vm424_vm1 = vcmask 130048  }
  0x11   :  { %357 = vmatpush.bf16.msra.mxu3 %v652_v15  ;;  %v651_v19 = vld [vmem:[%s876_s1 + $0xd8] sm:$0xff]  ;;  %v634_v21 = vld [vmem:[%s876_s1 + $0x50] sm:$0xff]  ;;  %v625_v24 = vld [vmem:[%s876_s1 + $0x8] sm:$0xff]  ;;  %s691_s19 = smov [#allocation2]   ;;  %s692_s23 = smov 128  }
  0x12   :  { %316 = vmatpush.bf16.msra.mxu0 %v627_v16  ;;  %v642_v22 = vld [vmem:[%s876_s1 + $0x90] sm:$0xff]  ;;  %v633_v25 = vld [vmem:[%s876_s1 + $0x48] sm:$0xff]  ;;  %v624_v28 = vld [vmem:[%s876_s1] sm:$0xff]  ;;  %s448_s20 = sshll.u32 %s691_s19, 4  ;;  %s693_s24 = smov 8   ;;  %s449_s20 = int_to_ptr.vmem [resolvable:$true] %s448_s20 }
  0x13   :  { %330 = vmatpush.bf16.msra.mxu1 %v635_v17  ;;  %v650_v23 = vld [vmem:[%s876_s1 + $0xd0] sm:$0xff]  ;;  %v641_v26 = vld [vmem:[%s876_s1 + $0x88] sm:$0xff]  ;;  %v632_v29 = vld [vmem:[%s876_s1 + $0x40] sm:$0xff] }
  0x14   :  { %344 = vmatpush.bf16.msra.mxu2 %v643_v18  ;;  %v649_v27 = vld [vmem:[%s876_s1 + $0xc8] sm:$0xff]  ;;  %v640_v30 = vld [vmem:[%s876_s1 + $0x80] sm:$0xff]  ;;  %v622_v33 = vld [vmem:[%s875_s0 + $0xc] sm:$0xf0] }
  0x15   :  { %358 = vmatpush.bf16.msra.mxu3 %v651_v19  ;;  %v648_v31 = vld [vmem:[%s876_s1 + $0xc0] sm:$0xff]  ;;  %v466_v35 = vld [vmem:[%s875_s0 + $0x10] sm:$0xf0]  ;;  %v472_v36 = vld [vmem:[%s875_s0 + $0x8] sm:$0xf] }
  0x16   :  { %317 = vmatpush.bf16.msra.mxu0 %v626_v20  ;;  %v464_v32 = vld [vmem:[%s875_s0] sm:$0xf]  ;;  %v620_v34 = vld [vmem:[%s875_s0 + $0x4] sm:$0xf]  ;;  %v623_v37 = vld [vmem:[%s875_s0 + $0x14] sm:$0xf0] }
  0x17   :  { %331 = vmatpush.bf16.msra.mxu1 %v634_v21  ;;  %v621_v38 = vld [vmem:[%s875_s0 + $0xc] sm:$0xf]  ;;  %v474_v39 = vld [vmem:[%s875_s0 + $0x18] sm:$0xf0]  ;;  %v465_v40 = vor.u32 %v622_v33, %v464_v32  ;;  %v469_v41 = vor.u32 %v620_v34, %v466_v35  ;;  %v473_v42 = vor.u32 %v623_v37, %v472_v36  ;;  %v656_v45 = vld [vmem:[%s878_s3] sm:$0xff] }
  0x18   :  { %345 = vmatpush.bf16.msra.mxu2 %v642_v22  ;;  %v477_v43 = vor.u32 %v621_v38, %v474_v39  ;;  %v657_v44 = vld [vmem:[%s878_s3 + $0x8] sm:$0xff]  ;;  %v658_v46 = vld [vmem:[%s880_s5] sm:$0xff] }
  0x19   :  { %359 = vmatpush.bf16.msra.mxu3 %v650_v23  ;;  %v662_v47 = vld [vmem:[%s877_s2] ss:$0 sm:$0xff] }
  0x1a   :  { %318 = vmatpush.bf16.msra.mxu0 %v625_v24  ;;  %v663_v4 = vld [vmem:[%s879_s4] ss:$0 sm:$0xff]  ;;  %s450_s4 = sshll.u32 %s882_s7, 4  ;;  %s451_s4 = int_to_ptr.hbm [resolvable:$true] %s450_s4 }
  0x1b   :  { %332 = vmatpush.bf16.msra.mxu1 %v633_v25  ;;  %v664_v11 = vld [vmem:[%s881_s6] ss:$0 sm:$0xff] }
  0x1c   :  { %346 = vmatpush.bf16.msra.mxu2 %v641_v26 }
  0x1d   :  { %360 = vmatpush.bf16.msra.mxu3 %v649_v27 }
  0x1e   :  { %319 = vmatpush.bf16.msra.mxu0 %v624_v28 }
  0x1f   :  { %333 = vmatpush.bf16.msra.mxu1 %v632_v29 }
  0x20   :  { %347 = vmatpush.bf16.msra.mxu2 %v640_v30 }
  0x21   :  { %361 = vmatpush.bf16.msra.mxu3 %v648_v31  ;;  %320 = vmatmul.bf16.vlgmr.msra.gmra.mxu0 %v465_v40 }
  0x22   :  { %334 = vmatmul.bf16.vlgmr.msra.gmra.mxu1 %v469_v41  ;;  %401 = vmatpush.bf16.msrb.mxu0 %v657_v44 }
  0x23   :  { %348 = vmatmul.bf16.vlgmr.msra.gmra.mxu2 %v473_v42  ;;  %435 = vmatpush.bf16.msrb.mxu1 %v658_v46 }
  0x24   :  { %362 = vmatmul.bf16.vlgmr.msra.gmra.mxu3 %v477_v43 }
  0x26   :  { %402 = vmatpush.bf16.msrb.mxu0 %v656_v45 }
  0x9e   :  { %v321_v48 = vpop.f32.mrf.mxu0 }
  0x9f   :  { %v335_v49 = vpop.f32.mrf.mxu1  ;;  %v322_v50 = vadd.f32 %v662_v47, %v321_v48 }
  0xa1   :  { %v336_v53 = vadd.f32 %v335_v49, %v322_v50 }
  0xa6   :  { %v349_v51 = vpop.f32.mrf.mxu2  ;;  %v323_v54 = vpop.f32.mrf.mxu0 }
  0xa7   :  { %v363_v52 = vpop.f32.mrf.mxu3  ;;  %v324_v55 = vadd.f32 %v662_v47, %v323_v54  ;;  %v350_v56 = vadd.f32 %v349_v51, %v336_v53  ;;  %v337_v57 = vpop.f32.mrf.mxu1 }
  0xa9   :  { %v338_v58 = vadd.f32 %v337_v57, %v324_v55  ;;  %v364_v60 = vadd.f32 %v363_v52, %v350_v56 }
  0xab   :  { %v368_v0 = vmax.f32 %v364_v60, 0.0 }
  0xae   :  { %v351_v59 = vpop.f32.mrf.mxu2 }
  0xaf   :  { %v352_v61 = vadd.f32 %v351_v59, %v338_v58  ;;  %v365_v62 = vpop.f32.mrf.mxu3 }
  0xb1   :  { %v366_v63 = vadd.f32 %v365_v62, %v352_v61 }
  0xb3   :  { %v369_v1 = vmax.f32 %v366_v63, 0.0 }
  0xb5   :  { %v370_v2 = vpack.c.bf16 %v369_v1, %v368_v0 }
  0xb7   :  { %614 = vmatmul.msk.bf16.vlgmr.msrb.gmra.mxu0 %vm391_vm0, %v370_v2 }
 0x134   :  { %v404_v3 = vpop.f32.mrf.mxu0 }
 0x135   :  { %v405_v5 = vadd.f32 %v663_v4, %v404_v3 }
 0x137   :  { %v409_v8 = vmax.f32 %v405_v5, 0.0 }
 0x13c   :  { %v406_v6 = vpop.f32.mrf.mxu0 }
 0x13d   :  { %v407_v7 = vadd.f32 %v663_v4, %v406_v6 }
 0x13f   :  { %v410_v9 = vmax.f32 %v407_v7, 0.0 }
 0x141   :  { %v411_v10 = vpack.c.bf16 %v410_v9, %v409_v8 }
 0x143   :  { %619 = vmatmul.msk.bf16.vlgmr.msrb.gmra.mxu1 %vm424_vm1, %v411_v10 }
 0x1c0   :  { %v437_v12 = vpop.f32.mrf.mxu1 }
 0x1c1   :  { %v438_v13 = vadd.f32 %v664_v11, %v437_v12 }
 0x1c3   :  { %442 = vst [vmem:[#allocation2] sm:$0xff] %v438_v13 }
 0x1c8   :  { %v439_v14 = vpop.f32.mrf.mxu1 }
 0x1c9   :  { %v440_v15 = vadd.f32 %v664_v11, %v439_v14 }
 0x1cb   :  { %443 = vst [vmem:[#allocation2 + $0x8] sm:$0xff] %v440_v15 }
 0x1cc   :  { %456 = dma.vmem_to_hbm [thread:$0]  %s449_s20, 256, %s451_s4, [#allocation3], %s692_s23, %s692_s23, %s693_s24  }
 0x1cd   :  { %689 = dma.done.wait [#allocation3], 256  }
 0x1ce   :  { %690 = vsyncadd [#allocation3], 4294967040 }
 0x1cf   :  { %461 = vsyncpa [#allocation3], 1 }

</bundles_post_ra>
